<compile_context>
chip_gen: v5e
topology: v5e:2x2
jax: 0.10.0
libtpu: 0.0.40
codegen_flags: <defaults>
</compile_context>

<pallas_src>
import functools

import jax
import jax.numpy as jnp
from jax import lax
from jax.experimental import pallas as pl
from jax.experimental.pallas import tpu as pltpu


def _round_up(x: int, m: int) -> int:
    return (x + m - 1) // m * m


def _pick_tok_block(n: int, target: int) -> int:
    """Pick the token-block size (multiple of 8, <= target)."""
    target = max(8, (int(target) // 8) * 8)
    if n % 8 == 0:
        # Prefer an exact multiple-of-8 divisor of n: no pad rows and no
        # post-kernel output slice.  Cap so the grid has >= 2 steps when
        # there is enough work (v7x megacore).
        cap = min(target, n // 2) if n >= 16 else min(target, n)
        cap = max(8, (cap // 8) * 8)
        best = 8
        for d in range(16, cap + 1, 8):
            if n % d == 0:
                best = d
        return best
    # Ragged n: pad to a multiple of tok_block; still aim for >= 2 grid steps.
    n8 = _round_up(n, 8)
    tb = min(target, n8)
    if n8 // 2 >= 8:
        tb = min(tb, (n8 // 2 // 8) * 8)
    return max(8, (tb // 8) * 8)


def _gather_kernel(nslots, direct, ids_ref, table_ref, out_ref, *scratch):
    """Gather one (tok_block, D) tile of token embeddings.

    ids_ref   : SMEM (N_pad,) int32 pre-clamped token ids (scalar-prefetched)
    table_ref : HBM  (V, D) embedding table (memory_space=ANY, manual DMA)
    out_ref   : VMEM (tok_block, D) output tile
    scratch   : (sem,)               when direct (out dtype == table dtype)
                (rows_vmem, sem)     when a cast is needed
    """
    if direct:
        (sem,) = scratch
        dst = out_ref                 # DMA rows straight into the output tile
    else:
        rows_vmem, sem = scratch
        dst = rows_vmem

    tok_block = out_ref.shape[0]
    n_total = ids_ref.shape[0]
    base = pl.program_id(0) * tok_block

    def start_row(row, slot, tok):
        pltpu.make_async_copy(
            table_ref.at[pl.ds(tok, 1), :],
            dst.at[pl.ds(row, 1), :],
            sem.at[slot],
        ).start()

    # Prime the DMA ring: nslots row fetches in flight.
    for r in range(nslots):
        start_row(r, r, ids_ref[base + r])

    def body(i, carry):
        slot = i & (nslots - 1)        # nslots is a power of two
        nxt = i + nslots
        # SMEM scalar read hoisted above the wait (.wait() breaks sst->sld
        # forwarding).  Index is clamped so it is always in-bounds; the value
        # is only used under the pl.when below.
        tok_next = ids_ref[jnp.minimum(base + nxt, n_total - 1)]

        # Wait for row i.  The src slice here is a placeholder: only the
        # (1, D) byte count and the semaphore must match the started copy.
        pltpu.make_async_copy(
            table_ref.at[pl.ds(0, 1), :],
            dst.at[pl.ds(i, 1), :],
            sem.at[slot],
        ).wait()

        # Refill this slot with row i + nslots (keep nslots outstanding).
        @pl.when(nxt < tok_block)
        def _():
            start_row(nxt, slot, tok_next)

        return carry

    lax.fori_loop(0, tok_block, body, 0, unroll=nslots)

    if not direct:
        # Cast path only: one lane-dense full-tile store.
        out_ref[...] = rows_vmem[...].astype(out_ref.dtype)


def clip_text_embeddings(input_ids, token_embedding_weight, *,
                         tok_block=512, nslots=16, out_dtype=None):
    """Pallas implementation of ExceptionCLIPTextEmbeddings.forward.

    input_ids              : (B, S) int
    token_embedding_weight : (V, D) float
    returns                : (B, S, D), out_dtype (defaults to table dtype)
    """
    B, S = input_ids.shape
    V, D = token_embedding_weight.shape
    if out_dtype is None:
        out_dtype = token_embedding_weight.dtype
    direct = jnp.dtype(out_dtype) == jnp.dtype(token_embedding_weight.dtype)

    N = B * S
    tok_block = _pick_tok_block(N, tok_block)
    n_pad = _round_up(N, tok_block)

    # DMA-ring depth: power of two (slot = i & (nslots-1)), no deeper than tile.
    nslots = max(1, min(int(nslots), tok_block))
    nslots = 1 << (nslots.bit_length() - 1)

    # Clamp ids once, vectorized, in the wrapper: padded / out-of-range ids
    # never turn into OOB HBM DMAs.  (Note: unlike nn.Embedding, bad ids are
    # silently mapped to valid rows instead of raising.)
    ids_flat = jnp.clip(input_ids.reshape(-1).astype(jnp.int32), 0, V - 1)
    if n_pad != N:
        ids_flat = jnp.pad(ids_flat, (0, n_pad - N))

    scratch = []
    if not direct:
        scratch.append(pltpu.VMEM((tok_block, D), token_embedding_weight.dtype))
    scratch.append(pltpu.SemaphoreType.DMA((nslots,)))

    grid_spec = pltpu.PrefetchScalarGridSpec(
        num_scalar_prefetch=1,                     # ids land in SMEM
        grid=(n_pad // tok_block,),
        in_specs=[
            pl.BlockSpec(memory_space=pl.ANY),     # table stays in HBM
        ],
        out_specs=pl.BlockSpec((tok_block, D), lambda t, ids: (t, 0)),
        scratch_shapes=scratch,
    )

    out_flat = pl.pallas_call(
        functools.partial(_gather_kernel, nslots, direct),
        out_shape=jax.ShapeDtypeStruct((n_pad, D), out_dtype),
        grid_spec=grid_spec,
        compiler_params=pltpu.CompilerParams(
            dimension_semantics=("parallel",)),
    )(ids_flat, token_embedding_weight)

    if n_pad != N:
        out_flat = out_flat[:N]
    return out_flat.reshape(B, S, D)


if __name__ == "__main__":
    # Small synthetic CLIPTextConfig-like sizes.
    vocab_size = 64
    hidden_size = 32
    max_position_embeddings = 16
    batch = 2
    seq = 8

    key = jax.random.PRNGKey(0)
    k_tok, k_pos, k_ids = jax.random.split(key, 3)

    # Deterministic "parameters" (shapes from the nn.Embedding's in __init__).
    token_embedding_weight = jax.random.normal(
        k_tok, (vocab_size, hidden_size), dtype=jnp.float32) * 0.02
    # TODO(synk): position_embedding / position_ids exist in __init__ but this
    # module's forward never adds them, so they are not part of the output.
    position_embedding_weight = jax.random.normal(
        k_pos, (max_position_embeddings, hidden_size), dtype=jnp.float32) * 0.02
    position_ids = jnp.arange(max_position_embeddings)[None, :]

    input_ids = jax.random.randint(
        k_ids, (batch, seq), minval=0, maxval=vocab_size, dtype=jnp.int32)

    out = clip_text_embeddings(input_ids, token_embedding_weight)
    out = jax.block_until_ready(out)

    # Reference check (plain JAX gather) — pure copy, so bit-exact.
    ref = jnp.take(token_embedding_weight, input_ids, axis=0)
    assert out.shape == (batch, seq, hidden_size)
    assert jnp.array_equal(out, ref), "mismatch vs reference gather"

    print("KERNEL_OK")
</pallas_src>

<mosaic_0001>
module attributes {stable_mosaic.version = 11 : i64} {
  func.func @_gather_kernel(%arg0: i32, %arg1: memref<16xi32, #tpu.memory_space<smem>>, %arg2: memref<64x32xf32, #tpu.memory_space<any>>, %arg3: memref<8x32xf32, #tpu.memory_space<vmem>>, %arg4: memref<8x!tpu.dma_semaphore, #tpu.memory_space<semaphore_mem>>) attributes {dimension_semantics = [#tpu.dimension_semantics<parallel>], iteration_bounds = array<i64: 2>, scalar_prefetch = 1 : i64, scratch_operands = 1 : i64, tpu.core_type = #tpu.core_type<tc>, window_params = [{}, {transform_indices = @transform_1, window_bounds = array<i64: 8, 32>}]} {
    %c8_i32 = arith.constant 8 : i32
    %0 = arith.muli %arg0, %c8_i32 : i32
    %c0_i32 = arith.constant 0 : i32
    %1 = arith.addi %0, %c0_i32 : i32
    %2 = arith.index_cast %1 : i32 to index
    %3 = memref.load %arg1[%2] : memref<16xi32, #tpu.memory_space<smem>>
    %c0_i32_0 = arith.constant 0 : i32
    %c0_i32_1 = arith.constant 0 : i32
    %4 = tpu.memref_slice %arg2[%3, %c0_i32_1] : memref<64x32xf32, #tpu.memory_space<any>> -> memref<1x32xf32, #tpu.memory_space<any>>
    %c0_i32_2 = arith.constant 0 : i32
    %c0_i32_3 = arith.constant 0 : i32
    %5 = tpu.memref_slice %arg3[%c0_i32_2, %c0_i32_3] : memref<8x32xf32, #tpu.memory_space<vmem>> -> memref<1x32xf32, #tpu.memory_space<vmem>>
    %6 = tpu.memref_slice %arg4[%c0_i32_0] : memref<8x!tpu.dma_semaphore, #tpu.memory_space<semaphore_mem>> -> memref<1x!tpu.dma_semaphore, #tpu.memory_space<semaphore_mem>>
    %7 = tpu.memref_squeeze %6 : memref<1x!tpu.dma_semaphore, #tpu.memory_space<semaphore_mem>> -> memref<!tpu.dma_semaphore, #tpu.memory_space<semaphore_mem>>
    tpu.enqueue_dma source(%4 : memref<1x32xf32, #tpu.memory_space<any>>) target(%5 : memref<1x32xf32, #tpu.memory_space<vmem>>) target_semaphore(%7 : memref<!tpu.dma_semaphore, #tpu.memory_space<semaphore_mem>>)
    %c1_i32 = arith.constant 1 : i32
    %8 = arith.addi %0, %c1_i32 : i32
    %9 = arith.index_cast %8 : i32 to index
    %10 = memref.load %arg1[%9] : memref<16xi32, #tpu.memory_space<smem>>
    %c1_i32_4 = arith.constant 1 : i32
    %c0_i32_5 = arith.constant 0 : i32
    %11 = tpu.memref_slice %arg2[%10, %c0_i32_5] : memref<64x32xf32, #tpu.memory_space<any>> -> memref<1x32xf32, #tpu.memory_space<any>>
    %c1_i32_6 = arith.constant 1 : i32
    %c0_i32_7 = arith.constant 0 : i32
    %12 = tpu.memref_slice %arg3[%c1_i32_6, %c0_i32_7] : memref<8x32xf32, #tpu.memory_space<vmem>> -> memref<1x32xf32, #tpu.memory_space<vmem>>
    %13 = tpu.memref_slice %arg4[%c1_i32_4] : memref<8x!tpu.dma_semaphore, #tpu.memory_space<semaphore_mem>> -> memref<1x!tpu.dma_semaphore, #tpu.memory_space<semaphore_mem>>
    %14 = tpu.memref_squeeze %13 : memref<1x!tpu.dma_semaphore, #tpu.memory_space<semaphore_mem>> -> memref<!tpu.dma_semaphore, #tpu.memory_space<semaphore_mem>>
    tpu.enqueue_dma source(%11 : memref<1x32xf32, #tpu.memory_space<any>>) target(%12 : memref<1x32xf32, #tpu.memory_space<vmem>>) target_semaphore(%14 : memref<!tpu.dma_semaphore, #tpu.memory_space<semaphore_mem>>)
    %c2_i32 = arith.constant 2 : i32
    %15 = arith.addi %0, %c2_i32 : i32
    %16 = arith.index_cast %15 : i32 to index
    %17 = memref.load %arg1[%16] : memref<16xi32, #tpu.memory_space<smem>>
    %c2_i32_8 = arith.constant 2 : i32
    %c0_i32_9 = arith.constant 0 : i32
    %18 = tpu.memref_slice %arg2[%17, %c0_i32_9] : memref<64x32xf32, #tpu.memory_space<any>> -> memref<1x32xf32, #tpu.memory_space<any>>
    %c2_i32_10 = arith.constant 2 : i32
    %c0_i32_11 = arith.constant 0 : i32
    %19 = tpu.memref_slice %arg3[%c2_i32_10, %c0_i32_11] : memref<8x32xf32, #tpu.memory_space<vmem>> -> memref<1x32xf32, #tpu.memory_space<vmem>>
    %20 = tpu.memref_slice %arg4[%c2_i32_8] : memref<8x!tpu.dma_semaphore, #tpu.memory_space<semaphore_mem>> -> memref<1x!tpu.dma_semaphore, #tpu.memory_space<semaphore_mem>>
    %21 = tpu.memref_squeeze %20 : memref<1x!tpu.dma_semaphore, #tpu.memory_space<semaphore_mem>> -> memref<!tpu.dma_semaphore, #tpu.memory_space<semaphore_mem>>
    tpu.enqueue_dma source(%18 : memref<1x32xf32, #tpu.memory_space<any>>) target(%19 : memref<1x32xf32, #tpu.memory_space<vmem>>) target_semaphore(%21 : memref<!tpu.dma_semaphore, #tpu.memory_space<semaphore_mem>>)
    %c3_i32 = arith.constant 3 : i32
    %22 = arith.addi %0, %c3_i32 : i32
    %23 = arith.index_cast %22 : i32 to index
    %24 = memref.load %arg1[%23] : memref<16xi32, #tpu.memory_space<smem>>
    %c3_i32_12 = arith.constant 3 : i32
    %c0_i32_13 = arith.constant 0 : i32
    %25 = tpu.memref_slice %arg2[%24, %c0_i32_13] : memref<64x32xf32, #tpu.memory_space<any>> -> memref<1x32xf32, #tpu.memory_space<any>>
    %c3_i32_14 = arith.constant 3 : i32
    %c0_i32_15 = arith.constant 0 : i32
    %26 = tpu.memref_slice %arg3[%c3_i32_14, %c0_i32_15] : memref<8x32xf32, #tpu.memory_space<vmem>> -> memref<1x32xf32, #tpu.memory_space<vmem>>
    %27 = tpu.memref_slice %arg4[%c3_i32_12] : memref<8x!tpu.dma_semaphore, #tpu.memory_space<semaphore_mem>> -> memref<1x!tpu.dma_semaphore, #tpu.memory_space<semaphore_mem>>
    %28 = tpu.memref_squeeze %27 : memref<1x!tpu.dma_semaphore, #tpu.memory_space<semaphore_mem>> -> memref<!tpu.dma_semaphore, #tpu.memory_space<semaphore_mem>>
    tpu.enqueue_dma source(%25 : memref<1x32xf32, #tpu.memory_space<any>>) target(%26 : memref<1x32xf32, #tpu.memory_space<vmem>>) target_semaphore(%28 : memref<!tpu.dma_semaphore, #tpu.memory_space<semaphore_mem>>)
    %c4_i32 = arith.constant 4 : i32
    %29 = arith.addi %0, %c4_i32 : i32
    %30 = arith.index_cast %29 : i32 to index
    %31 = memref.load %arg1[%30] : memref<16xi32, #tpu.memory_space<smem>>
    %c4_i32_16 = arith.constant 4 : i32
    %c0_i32_17 = arith.constant 0 : i32
    %32 = tpu.memref_slice %arg2[%31, %c0_i32_17] : memref<64x32xf32, #tpu.memory_space<any>> -> memref<1x32xf32, #tpu.memory_space<any>>
    %c4_i32_18 = arith.constant 4 : i32
    %c0_i32_19 = arith.constant 0 : i32
    %33 = tpu.memref_slice %arg3[%c4_i32_18, %c0_i32_19] : memref<8x32xf32, #tpu.memory_space<vmem>> -> memref<1x32xf32, #tpu.memory_space<vmem>>
    %34 = tpu.memref_slice %arg4[%c4_i32_16] : memref<8x!tpu.dma_semaphore, #tpu.memory_space<semaphore_mem>> -> memref<1x!tpu.dma_semaphore, #tpu.memory_space<semaphore_mem>>
    %35 = tpu.memref_squeeze %34 : memref<1x!tpu.dma_semaphore, #tpu.memory_space<semaphore_mem>> -> memref<!tpu.dma_semaphore, #tpu.memory_space<semaphore_mem>>
    tpu.enqueue_dma source(%32 : memref<1x32xf32, #tpu.memory_space<any>>) target(%33 : memref<1x32xf32, #tpu.memory_space<vmem>>) target_semaphore(%35 : memref<!tpu.dma_semaphore, #tpu.memory_space<semaphore_mem>>)
    %c5_i32 = arith.constant 5 : i32
    %36 = arith.addi %0, %c5_i32 : i32
    %37 = arith.index_cast %36 : i32 to index
    %38 = memref.load %arg1[%37] : memref<16xi32, #tpu.memory_space<smem>>
    %c5_i32_20 = arith.constant 5 : i32
    %c0_i32_21 = arith.constant 0 : i32
    %39 = tpu.memref_slice %arg2[%38, %c0_i32_21] : memref<64x32xf32, #tpu.memory_space<any>> -> memref<1x32xf32, #tpu.memory_space<any>>
    %c5_i32_22 = arith.constant 5 : i32
    %c0_i32_23 = arith.constant 0 : i32
    %40 = tpu.memref_slice %arg3[%c5_i32_22, %c0_i32_23] : memref<8x32xf32, #tpu.memory_space<vmem>> -> memref<1x32xf32, #tpu.memory_space<vmem>>
    %41 = tpu.memref_slice %arg4[%c5_i32_20] : memref<8x!tpu.dma_semaphore, #tpu.memory_space<semaphore_mem>> -> memref<1x!tpu.dma_semaphore, #tpu.memory_space<semaphore_mem>>
    %42 = tpu.memref_squeeze %41 : memref<1x!tpu.dma_semaphore, #tpu.memory_space<semaphore_mem>> -> memref<!tpu.dma_semaphore, #tpu.memory_space<semaphore_mem>>
    tpu.enqueue_dma source(%39 : memref<1x32xf32, #tpu.memory_space<any>>) target(%40 : memref<1x32xf32, #tpu.memory_space<vmem>>) target_semaphore(%42 : memref<!tpu.dma_semaphore, #tpu.memory_space<semaphore_mem>>)
    %c6_i32 = arith.constant 6 : i32
    %43 = arith.addi %0, %c6_i32 : i32
    %44 = arith.index_cast %43 : i32 to index
    %45 = memref.load %arg1[%44] : memref<16xi32, #tpu.memory_space<smem>>
    %c6_i32_24 = arith.constant 6 : i32
    %c0_i32_25 = arith.constant 0 : i32
    %46 = tpu.memref_slice %arg2[%45, %c0_i32_25] : memref<64x32xf32, #tpu.memory_space<any>> -> memref<1x32xf32, #tpu.memory_space<any>>
    %c6_i32_26 = arith.constant 6 : i32
    %c0_i32_27 = arith.constant 0 : i32
    %47 = tpu.memref_slice %arg3[%c6_i32_26, %c0_i32_27] : memref<8x32xf32, #tpu.memory_space<vmem>> -> memref<1x32xf32, #tpu.memory_space<vmem>>
    %48 = tpu.memref_slice %arg4[%c6_i32_24] : memref<8x!tpu.dma_semaphore, #tpu.memory_space<semaphore_mem>> -> memref<1x!tpu.dma_semaphore, #tpu.memory_space<semaphore_mem>>
    %49 = tpu.memref_squeeze %48 : memref<1x!tpu.dma_semaphore, #tpu.memory_space<semaphore_mem>> -> memref<!tpu.dma_semaphore, #tpu.memory_space<semaphore_mem>>
    tpu.enqueue_dma source(%46 : memref<1x32xf32, #tpu.memory_space<any>>) target(%47 : memref<1x32xf32, #tpu.memory_space<vmem>>) target_semaphore(%49 : memref<!tpu.dma_semaphore, #tpu.memory_space<semaphore_mem>>)
    %c7_i32 = arith.constant 7 : i32
    %50 = arith.addi %0, %c7_i32 : i32
    %51 = arith.index_cast %50 : i32 to index
    %52 = memref.load %arg1[%51] : memref<16xi32, #tpu.memory_space<smem>>
    %c7_i32_28 = arith.constant 7 : i32
    %c0_i32_29 = arith.constant 0 : i32
    %53 = tpu.memref_slice %arg2[%52, %c0_i32_29] : memref<64x32xf32, #tpu.memory_space<any>> -> memref<1x32xf32, #tpu.memory_space<any>>
    %c7_i32_30 = arith.constant 7 : i32
    %c0_i32_31 = arith.constant 0 : i32
    %54 = tpu.memref_slice %arg3[%c7_i32_30, %c0_i32_31] : memref<8x32xf32, #tpu.memory_space<vmem>> -> memref<1x32xf32, #tpu.memory_space<vmem>>
    %55 = tpu.memref_slice %arg4[%c7_i32_28] : memref<8x!tpu.dma_semaphore, #tpu.memory_space<semaphore_mem>> -> memref<1x!tpu.dma_semaphore, #tpu.memory_space<semaphore_mem>>
    %56 = tpu.memref_squeeze %55 : memref<1x!tpu.dma_semaphore, #tpu.memory_space<semaphore_mem>> -> memref<!tpu.dma_semaphore, #tpu.memory_space<semaphore_mem>>
    tpu.enqueue_dma source(%53 : memref<1x32xf32, #tpu.memory_space<any>>) target(%54 : memref<1x32xf32, #tpu.memory_space<vmem>>) target_semaphore(%56 : memref<!tpu.dma_semaphore, #tpu.memory_space<semaphore_mem>>)
    %c0_i32_32 = arith.constant 0 : i32
    %c7_i32_33 = arith.constant 7 : i32
    %57 = arith.andi %c0_i32_32, %c7_i32_33 : i32
    %c8_i32_34 = arith.constant 8 : i32
    %58 = arith.addi %c0_i32_32, %c8_i32_34 : i32
    %59 = arith.addi %0, %58 : i32
    %c15_i32 = arith.constant 15 : i32
    %60 = arith.minsi %59, %c15_i32 : i32
    %61 = arith.index_cast %60 : i32 to index
    %62 = memref.load %arg1[%61] : memref<16xi32, #tpu.memory_space<smem>>
    %c0_i32_35 = arith.constant 0 : i32
    %c0_i32_36 = arith.constant 0 : i32
    %63 = tpu.memref_slice %arg2[%c0_i32_35, %c0_i32_36] : memref<64x32xf32, #tpu.memory_space<any>> -> memref<1x32xf32, #tpu.memory_space<any>>
    %c0_i32_37 = arith.constant 0 : i32
    %64 = tpu.memref_slice %arg3[%c0_i32_32, %c0_i32_37] : memref<8x32xf32, #tpu.memory_space<vmem>> -> memref<1x32xf32, #tpu.memory_space<vmem>>
    %65 = tpu.memref_slice %arg4[%57] : memref<8x!tpu.dma_semaphore, #tpu.memory_space<semaphore_mem>> -> memref<1x!tpu.dma_semaphore, #tpu.memory_space<semaphore_mem>>
    %66 = tpu.memref_squeeze %65 : memref<1x!tpu.dma_semaphore, #tpu.memory_space<semaphore_mem>> -> memref<!tpu.dma_semaphore, #tpu.memory_space<semaphore_mem>>
    tpu.wait_dma2 semaphore(%66 : memref<!tpu.dma_semaphore, #tpu.memory_space<semaphore_mem>>) src(%63 : memref<1x32xf32, #tpu.memory_space<any>>) dst(%64 : memref<1x32xf32, #tpu.memory_space<vmem>>)
    %c8_i32_38 = arith.constant 8 : i32
    %67 = arith.cmpi slt, %58, %c8_i32_38 : i32
    %68 = arith.extui %67 : i1 to i32
    %c0_i32_39 = arith.constant 0 : i32
    %69 = arith.cmpi ne, %68, %c0_i32_39 : i32
    scf.if %69 {
      %c0_i32_104 = arith.constant 0 : i32
      %161 = tpu.memref_slice %arg2[%62, %c0_i32_104] : memref<64x32xf32, #tpu.memory_space<any>> -> memref<1x32xf32, #tpu.memory_space<any>>
      %c0_i32_105 = arith.constant 0 : i32
      %162 = tpu.memref_slice %arg3[%58, %c0_i32_105] : memref<8x32xf32, #tpu.memory_space<vmem>> -> memref<1x32xf32, #tpu.memory_space<vmem>>
      %163 = tpu.memref_slice %arg4[%57] : memref<8x!tpu.dma_semaphore, #tpu.memory_space<semaphore_mem>> -> memref<1x!tpu.dma_semaphore, #tpu.memory_space<semaphore_mem>>
      %164 = tpu.memref_squeeze %163 : memref<1x!tpu.dma_semaphore, #tpu.memory_space<semaphore_mem>> -> memref<!tpu.dma_semaphore, #tpu.memory_space<semaphore_mem>>
      tpu.enqueue_dma source(%161 : memref<1x32xf32, #tpu.memory_space<any>>) target(%162 : memref<1x32xf32, #tpu.memory_space<vmem>>) target_semaphore(%164 : memref<!tpu.dma_semaphore, #tpu.memory_space<semaphore_mem>>)
    } else {
    }
    %c1_i32_40 = arith.constant 1 : i32
    %c7_i32_41 = arith.constant 7 : i32
    %70 = arith.andi %c1_i32_40, %c7_i32_41 : i32
    %c8_i32_42 = arith.constant 8 : i32
    %71 = arith.addi %c1_i32_40, %c8_i32_42 : i32
    %72 = arith.addi %0, %71 : i32
    %c15_i32_43 = arith.constant 15 : i32
    %73 = arith.minsi %72, %c15_i32_43 : i32
    %74 = arith.index_cast %73 : i32 to index
    %75 = memref.load %arg1[%74] : memref<16xi32, #tpu.memory_space<smem>>
    %c0_i32_44 = arith.constant 0 : i32
    %c0_i32_45 = arith.constant 0 : i32
    %76 = tpu.memref_slice %arg2[%c0_i32_44, %c0_i32_45] : memref<64x32xf32, #tpu.memory_space<any>> -> memref<1x32xf32, #tpu.memory_space<any>>
    %c0_i32_46 = arith.constant 0 : i32
    %77 = tpu.memref_slice %arg3[%c1_i32_40, %c0_i32_46] : memref<8x32xf32, #tpu.memory_space<vmem>> -> memref<1x32xf32, #tpu.memory_space<vmem>>
    %78 = tpu.memref_slice %arg4[%70] : memref<8x!tpu.dma_semaphore, #tpu.memory_space<semaphore_mem>> -> memref<1x!tpu.dma_semaphore, #tpu.memory_space<semaphore_mem>>
    %79 = tpu.memref_squeeze %78 : memref<1x!tpu.dma_semaphore, #tpu.memory_space<semaphore_mem>> -> memref<!tpu.dma_semaphore, #tpu.memory_space<semaphore_mem>>
    tpu.wait_dma2 semaphore(%79 : memref<!tpu.dma_semaphore, #tpu.memory_space<semaphore_mem>>) src(%76 : memref<1x32xf32, #tpu.memory_space<any>>) dst(%77 : memref<1x32xf32, #tpu.memory_space<vmem>>)
    %c8_i32_47 = arith.constant 8 : i32
    %80 = arith.cmpi slt, %71, %c8_i32_47 : i32
    %81 = arith.extui %80 : i1 to i32
    %c0_i32_48 = arith.constant 0 : i32
    %82 = arith.cmpi ne, %81, %c0_i32_48 : i32
    scf.if %82 {
      %c0_i32_104 = arith.constant 0 : i32
      %161 = tpu.memref_slice %arg2[%75, %c0_i32_104] : memref<64x32xf32, #tpu.memory_space<any>> -> memref<1x32xf32, #tpu.memory_space<any>>
      %c0_i32_105 = arith.constant 0 : i32
      %162 = tpu.memref_slice %arg3[%71, %c0_i32_105] : memref<8x32xf32, #tpu.memory_space<vmem>> -> memref<1x32xf32, #tpu.memory_space<vmem>>
      %163 = tpu.memref_slice %arg4[%70] : memref<8x!tpu.dma_semaphore, #tpu.memory_space<semaphore_mem>> -> memref<1x!tpu.dma_semaphore, #tpu.memory_space<semaphore_mem>>
      %164 = tpu.memref_squeeze %163 : memref<1x!tpu.dma_semaphore, #tpu.memory_space<semaphore_mem>> -> memref<!tpu.dma_semaphore, #tpu.memory_space<semaphore_mem>>
      tpu.enqueue_dma source(%161 : memref<1x32xf32, #tpu.memory_space<any>>) target(%162 : memref<1x32xf32, #tpu.memory_space<vmem>>) target_semaphore(%164 : memref<!tpu.dma_semaphore, #tpu.memory_space<semaphore_mem>>)
    } else {
    }
    %c2_i32_49 = arith.constant 2 : i32
    %c7_i32_50 = arith.constant 7 : i32
    %83 = arith.andi %c2_i32_49, %c7_i32_50 : i32
    %c8_i32_51 = arith.constant 8 : i32
    %84 = arith.addi %c2_i32_49, %c8_i32_51 : i32
    %85 = arith.addi %0, %84 : i32
    %c15_i32_52 = arith.constant 15 : i32
    %86 = arith.minsi %85, %c15_i32_52 : i32
    %87 = arith.index_cast %86 : i32 to index
    %88 = memref.load %arg1[%87] : memref<16xi32, #tpu.memory_space<smem>>
    %c0_i32_53 = arith.constant 0 : i32
    %c0_i32_54 = arith.constant 0 : i32
    %89 = tpu.memref_slice %arg2[%c0_i32_53, %c0_i32_54] : memref<64x32xf32, #tpu.memory_space<any>> -> memref<1x32xf32, #tpu.memory_space<any>>
    %c0_i32_55 = arith.constant 0 : i32
    %90 = tpu.memref_slice %arg3[%c2_i32_49, %c0_i32_55] : memref<8x32xf32, #tpu.memory_space<vmem>> -> memref<1x32xf32, #tpu.memory_space<vmem>>
    %91 = tpu.memref_slice %arg4[%83] : memref<8x!tpu.dma_semaphore, #tpu.memory_space<semaphore_mem>> -> memref<1x!tpu.dma_semaphore, #tpu.memory_space<semaphore_mem>>
    %92 = tpu.memref_squeeze %91 : memref<1x!tpu.dma_semaphore, #tpu.memory_space<semaphore_mem>> -> memref<!tpu.dma_semaphore, #tpu.memory_space<semaphore_mem>>
    tpu.wait_dma2 semaphore(%92 : memref<!tpu.dma_semaphore, #tpu.memory_space<semaphore_mem>>) src(%89 : memref<1x32xf32, #tpu.memory_space<any>>) dst(%90 : memref<1x32xf32, #tpu.memory_space<vmem>>)
    %c8_i32_56 = arith.constant 8 : i32
    %93 = arith.cmpi slt, %84, %c8_i32_56 : i32
    %94 = arith.extui %93 : i1 to i32
    %c0_i32_57 = arith.constant 0 : i32
    %95 = arith.cmpi ne, %94, %c0_i32_57 : i32
    scf.if %95 {
      %c0_i32_104 = arith.constant 0 : i32
      %161 = tpu.memref_slice %arg2[%88, %c0_i32_104] : memref<64x32xf32, #tpu.memory_space<any>> -> memref<1x32xf32, #tpu.memory_space<any>>
      %c0_i32_105 = arith.constant 0 : i32
      %162 = tpu.memref_slice %arg3[%84, %c0_i32_105] : memref<8x32xf32, #tpu.memory_space<vmem>> -> memref<1x32xf32, #tpu.memory_space<vmem>>
      %163 = tpu.memref_slice %arg4[%83] : memref<8x!tpu.dma_semaphore, #tpu.memory_space<semaphore_mem>> -> memref<1x!tpu.dma_semaphore, #tpu.memory_space<semaphore_mem>>
      %164 = tpu.memref_squeeze %163 : memref<1x!tpu.dma_semaphore, #tpu.memory_space<semaphore_mem>> -> memref<!tpu.dma_semaphore, #tpu.memory_space<semaphore_mem>>
      tpu.enqueue_dma source(%161 : memref<1x32xf32, #tpu.memory_space<any>>) target(%162 : memref<1x32xf32, #tpu.memory_space<vmem>>) target_semaphore(%164 : memref<!tpu.dma_semaphore, #tpu.memory_space<semaphore_mem>>)
    } else {
    }
    %c3_i32_58 = arith.constant 3 : i32
    %c7_i32_59 = arith.constant 7 : i32
    %96 = arith.andi %c3_i32_58, %c7_i32_59 : i32
    %c8_i32_60 = arith.constant 8 : i32
    %97 = arith.addi %c3_i32_58, %c8_i32_60 : i32
    %98 = arith.addi %0, %97 : i32
    %c15_i32_61 = arith.constant 15 : i32
    %99 = arith.minsi %98, %c15_i32_61 : i32
    %100 = arith.index_cast %99 : i32 to index
    %101 = memref.load %arg1[%100] : memref<16xi32, #tpu.memory_space<smem>>
    %c0_i32_62 = arith.constant 0 : i32
    %c0_i32_63 = arith.constant 0 : i32
    %102 = tpu.memref_slice %arg2[%c0_i32_62, %c0_i32_63] : memref<64x32xf32, #tpu.memory_space<any>> -> memref<1x32xf32, #tpu.memory_space<any>>
    %c0_i32_64 = arith.constant 0 : i32
    %103 = tpu.memref_slice %arg3[%c3_i32_58, %c0_i32_64] : memref<8x32xf32, #tpu.memory_space<vmem>> -> memref<1x32xf32, #tpu.memory_space<vmem>>
    %104 = tpu.memref_slice %arg4[%96] : memref<8x!tpu.dma_semaphore, #tpu.memory_space<semaphore_mem>> -> memref<1x!tpu.dma_semaphore, #tpu.memory_space<semaphore_mem>>
    %105 = tpu.memref_squeeze %104 : memref<1x!tpu.dma_semaphore, #tpu.memory_space<semaphore_mem>> -> memref<!tpu.dma_semaphore, #tpu.memory_space<semaphore_mem>>
    tpu.wait_dma2 semaphore(%105 : memref<!tpu.dma_semaphore, #tpu.memory_space<semaphore_mem>>) src(%102 : memref<1x32xf32, #tpu.memory_space<any>>) dst(%103 : memref<1x32xf32, #tpu.memory_space<vmem>>)
    %c8_i32_65 = arith.constant 8 : i32
    %106 = arith.cmpi slt, %97, %c8_i32_65 : i32
    %107 = arith.extui %106 : i1 to i32
    %c0_i32_66 = arith.constant 0 : i32
    %108 = arith.cmpi ne, %107, %c0_i32_66 : i32
    scf.if %108 {
      %c0_i32_104 = arith.constant 0 : i32
      %161 = tpu.memref_slice %arg2[%101, %c0_i32_104] : memref<64x32xf32, #tpu.memory_space<any>> -> memref<1x32xf32, #tpu.memory_space<any>>
      %c0_i32_105 = arith.constant 0 : i32
      %162 = tpu.memref_slice %arg3[%97, %c0_i32_105] : memref<8x32xf32, #tpu.memory_space<vmem>> -> memref<1x32xf32, #tpu.memory_space<vmem>>
      %163 = tpu.memref_slice %arg4[%96] : memref<8x!tpu.dma_semaphore, #tpu.memory_space<semaphore_mem>> -> memref<1x!tpu.dma_semaphore, #tpu.memory_space<semaphore_mem>>
      %164 = tpu.memref_squeeze %163 : memref<1x!tpu.dma_semaphore, #tpu.memory_space<semaphore_mem>> -> memref<!tpu.dma_semaphore, #tpu.memory_space<semaphore_mem>>
      tpu.enqueue_dma source(%161 : memref<1x32xf32, #tpu.memory_space<any>>) target(%162 : memref<1x32xf32, #tpu.memory_space<vmem>>) target_semaphore(%164 : memref<!tpu.dma_semaphore, #tpu.memory_space<semaphore_mem>>)
    } else {
    }
    %c4_i32_67 = arith.constant 4 : i32
    %c7_i32_68 = arith.constant 7 : i32
    %109 = arith.andi %c4_i32_67, %c7_i32_68 : i32
    %c8_i32_69 = arith.constant 8 : i32
    %110 = arith.addi %c4_i32_67, %c8_i32_69 : i32
    %111 = arith.addi %0, %110 : i32
    %c15_i32_70 = arith.constant 15 : i32
    %112 = arith.minsi %111, %c15_i32_70 : i32
    %113 = arith.index_cast %112 : i32 to index
    %114 = memref.load %arg1[%113] : memref<16xi32, #tpu.memory_space<smem>>
    %c0_i32_71 = arith.constant 0 : i32
    %c0_i32_72 = arith.constant 0 : i32
    %115 = tpu.memref_slice %arg2[%c0_i32_71, %c0_i32_72] : memref<64x32xf32, #tpu.memory_space<any>> -> memref<1x32xf32, #tpu.memory_space<any>>
    %c0_i32_73 = arith.constant 0 : i32
    %116 = tpu.memref_slice %arg3[%c4_i32_67, %c0_i32_73] : memref<8x32xf32, #tpu.memory_space<vmem>> -> memref<1x32xf32, #tpu.memory_space<vmem>>
    %117 = tpu.memref_slice %arg4[%109] : memref<8x!tpu.dma_semaphore, #tpu.memory_space<semaphore_mem>> -> memref<1x!tpu.dma_semaphore, #tpu.memory_space<semaphore_mem>>
    %118 = tpu.memref_squeeze %117 : memref<1x!tpu.dma_semaphore, #tpu.memory_space<semaphore_mem>> -> memref<!tpu.dma_semaphore, #tpu.memory_space<semaphore_mem>>
    tpu.wait_dma2 semaphore(%118 : memref<!tpu.dma_semaphore, #tpu.memory_space<semaphore_mem>>) src(%115 : memref<1x32xf32, #tpu.memory_space<any>>) dst(%116 : memref<1x32xf32, #tpu.memory_space<vmem>>)
    %c8_i32_74 = arith.constant 8 : i32
    %119 = arith.cmpi slt, %110, %c8_i32_74 : i32
    %120 = arith.extui %119 : i1 to i32
    %c0_i32_75 = arith.constant 0 : i32
    %121 = arith.cmpi ne, %120, %c0_i32_75 : i32
    scf.if %121 {
      %c0_i32_104 = arith.constant 0 : i32
      %161 = tpu.memref_slice %arg2[%114, %c0_i32_104] : memref<64x32xf32, #tpu.memory_space<any>> -> memref<1x32xf32, #tpu.memory_space<any>>
      %c0_i32_105 = arith.constant 0 : i32
      %162 = tpu.memref_slice %arg3[%110, %c0_i32_105] : memref<8x32xf32, #tpu.memory_space<vmem>> -> memref<1x32xf32, #tpu.memory_space<vmem>>
      %163 = tpu.memref_slice %arg4[%109] : memref<8x!tpu.dma_semaphore, #tpu.memory_space<semaphore_mem>> -> memref<1x!tpu.dma_semaphore, #tpu.memory_space<semaphore_mem>>
      %164 = tpu.memref_squeeze %163 : memref<1x!tpu.dma_semaphore, #tpu.memory_space<semaphore_mem>> -> memref<!tpu.dma_semaphore, #tpu.memory_space<semaphore_mem>>
      tpu.enqueue_dma source(%161 : memref<1x32xf32, #tpu.memory_space<any>>) target(%162 : memref<1x32xf32, #tpu.memory_space<vmem>>) target_semaphore(%164 : memref<!tpu.dma_semaphore, #tpu.memory_space<semaphore_mem>>)
    } else {
    }
    %c5_i32_76 = arith.constant 5 : i32
    %c7_i32_77 = arith.constant 7 : i32
    %122 = arith.andi %c5_i32_76, %c7_i32_77 : i32
    %c8_i32_78 = arith.constant 8 : i32
    %123 = arith.addi %c5_i32_76, %c8_i32_78 : i32
    %124 = arith.addi %0, %123 : i32
    %c15_i32_79 = arith.constant 15 : i32
    %125 = arith.minsi %124, %c15_i32_79 : i32
    %126 = arith.index_cast %125 : i32 to index
    %127 = memref.load %arg1[%126] : memref<16xi32, #tpu.memory_space<smem>>
    %c0_i32_80 = arith.constant 0 : i32
    %c0_i32_81 = arith.constant 0 : i32
    %128 = tpu.memref_slice %arg2[%c0_i32_80, %c0_i32_81] : memref<64x32xf32, #tpu.memory_space<any>> -> memref<1x32xf32, #tpu.memory_space<any>>
    %c0_i32_82 = arith.constant 0 : i32
    %129 = tpu.memref_slice %arg3[%c5_i32_76, %c0_i32_82] : memref<8x32xf32, #tpu.memory_space<vmem>> -> memref<1x32xf32, #tpu.memory_space<vmem>>
    %130 = tpu.memref_slice %arg4[%122] : memref<8x!tpu.dma_semaphore, #tpu.memory_space<semaphore_mem>> -> memref<1x!tpu.dma_semaphore, #tpu.memory_space<semaphore_mem>>
    %131 = tpu.memref_squeeze %130 : memref<1x!tpu.dma_semaphore, #tpu.memory_space<semaphore_mem>> -> memref<!tpu.dma_semaphore, #tpu.memory_space<semaphore_mem>>
    tpu.wait_dma2 semaphore(%131 : memref<!tpu.dma_semaphore, #tpu.memory_space<semaphore_mem>>) src(%128 : memref<1x32xf32, #tpu.memory_space<any>>) dst(%129 : memref<1x32xf32, #tpu.memory_space<vmem>>)
    %c8_i32_83 = arith.constant 8 : i32
    %132 = arith.cmpi slt, %123, %c8_i32_83 : i32
    %133 = arith.extui %132 : i1 to i32
    %c0_i32_84 = arith.constant 0 : i32
    %134 = arith.cmpi ne, %133, %c0_i32_84 : i32
    scf.if %134 {
      %c0_i32_104 = arith.constant 0 : i32
      %161 = tpu.memref_slice %arg2[%127, %c0_i32_104] : memref<64x32xf32, #tpu.memory_space<any>> -> memref<1x32xf32, #tpu.memory_space<any>>
      %c0_i32_105 = arith.constant 0 : i32
      %162 = tpu.memref_slice %arg3[%123, %c0_i32_105] : memref<8x32xf32, #tpu.memory_space<vmem>> -> memref<1x32xf32, #tpu.memory_space<vmem>>
      %163 = tpu.memref_slice %arg4[%122] : memref<8x!tpu.dma_semaphore, #tpu.memory_space<semaphore_mem>> -> memref<1x!tpu.dma_semaphore, #tpu.memory_space<semaphore_mem>>
      %164 = tpu.memref_squeeze %163 : memref<1x!tpu.dma_semaphore, #tpu.memory_space<semaphore_mem>> -> memref<!tpu.dma_semaphore, #tpu.memory_space<semaphore_mem>>
      tpu.enqueue_dma source(%161 : memref<1x32xf32, #tpu.memory_space<any>>) target(%162 : memref<1x32xf32, #tpu.memory_space<vmem>>) target_semaphore(%164 : memref<!tpu.dma_semaphore, #tpu.memory_space<semaphore_mem>>)
    } else {
    }
    %c6_i32_85 = arith.constant 6 : i32
    %c7_i32_86 = arith.constant 7 : i32
    %135 = arith.andi %c6_i32_85, %c7_i32_86 : i32
    %c8_i32_87 = arith.constant 8 : i32
    %136 = arith.addi %c6_i32_85, %c8_i32_87 : i32
    %137 = arith.addi %0, %136 : i32
    %c15_i32_88 = arith.constant 15 : i32
    %138 = arith.minsi %137, %c15_i32_88 : i32
    %139 = arith.index_cast %138 : i32 to index
    %140 = memref.load %arg1[%139] : memref<16xi32, #tpu.memory_space<smem>>
    %c0_i32_89 = arith.constant 0 : i32
    %c0_i32_90 = arith.constant 0 : i32
    %141 = tpu.memref_slice %arg2[%c0_i32_89, %c0_i32_90] : memref<64x32xf32, #tpu.memory_space<any>> -> memref<1x32xf32, #tpu.memory_space<any>>
    %c0_i32_91 = arith.constant 0 : i32
    %142 = tpu.memref_slice %arg3[%c6_i32_85, %c0_i32_91] : memref<8x32xf32, #tpu.memory_space<vmem>> -> memref<1x32xf32, #tpu.memory_space<vmem>>
    %143 = tpu.memref_slice %arg4[%135] : memref<8x!tpu.dma_semaphore, #tpu.memory_space<semaphore_mem>> -> memref<1x!tpu.dma_semaphore, #tpu.memory_space<semaphore_mem>>
    %144 = tpu.memref_squeeze %143 : memref<1x!tpu.dma_semaphore, #tpu.memory_space<semaphore_mem>> -> memref<!tpu.dma_semaphore, #tpu.memory_space<semaphore_mem>>
    tpu.wait_dma2 semaphore(%144 : memref<!tpu.dma_semaphore, #tpu.memory_space<semaphore_mem>>) src(%141 : memref<1x32xf32, #tpu.memory_space<any>>) dst(%142 : memref<1x32xf32, #tpu.memory_space<vmem>>)
    %c8_i32_92 = arith.constant 8 : i32
    %145 = arith.cmpi slt, %136, %c8_i32_92 : i32
    %146 = arith.extui %145 : i1 to i32
    %c0_i32_93 = arith.constant 0 : i32
    %147 = arith.cmpi ne, %146, %c0_i32_93 : i32
    scf.if %147 {
      %c0_i32_104 = arith.constant 0 : i32
      %161 = tpu.memref_slice %arg2[%140, %c0_i32_104] : memref<64x32xf32, #tpu.memory_space<any>> -> memref<1x32xf32, #tpu.memory_space<any>>
      %c0_i32_105 = arith.constant 0 : i32
      %162 = tpu.memref_slice %arg3[%136, %c0_i32_105] : memref<8x32xf32, #tpu.memory_space<vmem>> -> memref<1x32xf32, #tpu.memory_space<vmem>>
      %163 = tpu.memref_slice %arg4[%135] : memref<8x!tpu.dma_semaphore, #tpu.memory_space<semaphore_mem>> -> memref<1x!tpu.dma_semaphore, #tpu.memory_space<semaphore_mem>>
      %164 = tpu.memref_squeeze %163 : memref<1x!tpu.dma_semaphore, #tpu.memory_space<semaphore_mem>> -> memref<!tpu.dma_semaphore, #tpu.memory_space<semaphore_mem>>
      tpu.enqueue_dma source(%161 : memref<1x32xf32, #tpu.memory_space<any>>) target(%162 : memref<1x32xf32, #tpu.memory_space<vmem>>) target_semaphore(%164 : memref<!tpu.dma_semaphore, #tpu.memory_space<semaphore_mem>>)
    } else {
    }
    %c7_i32_94 = arith.constant 7 : i32
    %c7_i32_95 = arith.constant 7 : i32
    %148 = arith.andi %c7_i32_94, %c7_i32_95 : i32
    %c8_i32_96 = arith.constant 8 : i32
    %149 = arith.addi %c7_i32_94, %c8_i32_96 : i32
    %150 = arith.addi %0, %149 : i32
    %c15_i32_97 = arith.constant 15 : i32
    %151 = arith.minsi %150, %c15_i32_97 : i32
    %152 = arith.index_cast %151 : i32 to index
    %153 = memref.load %arg1[%152] : memref<16xi32, #tpu.memory_space<smem>>
    %c0_i32_98 = arith.constant 0 : i32
    %c0_i32_99 = arith.constant 0 : i32
    %154 = tpu.memref_slice %arg2[%c0_i32_98, %c0_i32_99] : memref<64x32xf32, #tpu.memory_space<any>> -> memref<1x32xf32, #tpu.memory_space<any>>
    %c0_i32_100 = arith.constant 0 : i32
    %155 = tpu.memref_slice %arg3[%c7_i32_94, %c0_i32_100] : memref<8x32xf32, #tpu.memory_space<vmem>> -> memref<1x32xf32, #tpu.memory_space<vmem>>
    %156 = tpu.memref_slice %arg4[%148] : memref<8x!tpu.dma_semaphore, #tpu.memory_space<semaphore_mem>> -> memref<1x!tpu.dma_semaphore, #tpu.memory_space<semaphore_mem>>
    %157 = tpu.memref_squeeze %156 : memref<1x!tpu.dma_semaphore, #tpu.memory_space<semaphore_mem>> -> memref<!tpu.dma_semaphore, #tpu.memory_space<semaphore_mem>>
    tpu.wait_dma2 semaphore(%157 : memref<!tpu.dma_semaphore, #tpu.memory_space<semaphore_mem>>) src(%154 : memref<1x32xf32, #tpu.memory_space<any>>) dst(%155 : memref<1x32xf32, #tpu.memory_space<vmem>>)
    %c8_i32_101 = arith.constant 8 : i32
    %158 = arith.cmpi slt, %149, %c8_i32_101 : i32
    %159 = arith.extui %158 : i1 to i32
    %c0_i32_102 = arith.constant 0 : i32
    %160 = arith.cmpi ne, %159, %c0_i32_102 : i32
    scf.if %160 {
      %c0_i32_104 = arith.constant 0 : i32
      %161 = tpu.memref_slice %arg2[%153, %c0_i32_104] : memref<64x32xf32, #tpu.memory_space<any>> -> memref<1x32xf32, #tpu.memory_space<any>>
      %c0_i32_105 = arith.constant 0 : i32
      %162 = tpu.memref_slice %arg3[%149, %c0_i32_105] : memref<8x32xf32, #tpu.memory_space<vmem>> -> memref<1x32xf32, #tpu.memory_space<vmem>>
      %163 = tpu.memref_slice %arg4[%148] : memref<8x!tpu.dma_semaphore, #tpu.memory_space<semaphore_mem>> -> memref<1x!tpu.dma_semaphore, #tpu.memory_space<semaphore_mem>>
      %164 = tpu.memref_squeeze %163 : memref<1x!tpu.dma_semaphore, #tpu.memory_space<semaphore_mem>> -> memref<!tpu.dma_semaphore, #tpu.memory_space<semaphore_mem>>
      tpu.enqueue_dma source(%161 : memref<1x32xf32, #tpu.memory_space<any>>) target(%162 : memref<1x32xf32, #tpu.memory_space<vmem>>) target_semaphore(%164 : memref<!tpu.dma_semaphore, #tpu.memory_space<semaphore_mem>>)
    } else {
    }
    %c8_i32_103 = arith.constant 8 : i32
    return
  }
  func.func @transform_1(%arg0: i32, %arg1: memref<16xi32, #tpu.memory_space<smem>>) -> (i32, i32) {
    %c0_i32 = arith.constant 0 : i32
    %c0_i32_0 = arith.constant 0 : i32
    return %arg0, %c0_i32 : i32, i32
  }
}

</mosaic_0001>

<bundles_post_ra>
// kernel: tpu_custom_call.1
= control target key start
LH: loop header
LB: loop body
LE: loop exit
PB: predicated region body
PF: predicated region fallthrough
CT: control target
= control target key end

     0   :  { %s679_s12 = smov [#allocation4]   ;;  %s814_s0 = inlined_call_operand.vmem [shape: s32[16], index: 0, kind: input, shape index: {}]   ;;  %s815_s1 = inlined_call_operand.vmem [shape: f32[64,32], index: 1, kind: input, shape index: {}]   ;;  %s816_s2 = inlined_call_operand.hbm [shape: f32[16,32], index: 2, kind: output, shape index: {}]  }
   0x1   :  { %s8_s11 = sshll.u32 %s814_s0, 4  ;;  %s9_s11 = int_to_ptr.vmem [resolvable:$true] %s8_s11 }
   0x2   :  { %11 = dma.vmem_to_smem %s9_s11, 16, %s679_s12, [#allocation3] }
   0x3   :  { %645 = dma.done.wait [#allocation3], 16 }
   0x4   :  { %646 = vsyncadd [#allocation3], 4294967280 }
   0x5   :  { %14 = sfence }
   0x6   :  { %15 = vsyncpa [#allocation6], 0 }
   0x7   :  { %17 = vsyncpa [#allocation6 + $0x1], 0  ;;  %s698_s13 = smov 0   ;;  %s700_s14 = smov 0  }
   0x8   :  { %s702_s15 = smov 0  }
   0x9 LB: > { %s537_s0 = sadd.s32 4294967295, %s677_s15   ;;  %s715_s16 = sadd.s32 1, %s677_s15   ;;  %s677_s15 = sphi %s702_s15, %s821_s15   ;;  %s673_s14 = sphi %s700_s14, %s820_s14   ;;  %s669_s13 = sphi %s698_s13, %s819_s13  }
   0xa   : > { %s26_s17 = ssub.s32 %s677_s15, %s715_s16  ;;  %s29_s18 = sadd.s32 1, %s673_s14 }
   0xb   : > { %p27_p0 = scmp.eq.s32.totalorder %s26_s17, 0  ;;  %p538_p1 = scmp.ne.s32.totalorder %s26_s17, 0 }
   0xc   : > { %p33_p2 = scmp.eq.s32.totalorder %s677_s15, 1  ;;  %p38_p3 = scmp.ne.s32.totalorder %s673_s14, %s669_s13 }
   0xd   : > { %s724_s19 = scalar_select %p27_p0, %s673_s14, %s29_s18  }
   0xe   : > { %p726_p4 = por %p538_p1, %p33_p2  ;;  %p39_p5 = scmp.eq.s32.totalorder %s537_s0, 1 }
   0xf   : > { %p539_p7 = scmp.ge.s32.totalorder %s677_s15, 2 }
  0x10   : > { %p730_p6 = por %p39_p5, %p38_p3  ;;  %s53_s22 = sand.u32 (!%p539_p7), 1, %s673_s14  }
  0x11   : > { %48 = sbr.rel (%p539_p7) target bundleno = 127 (0x7f), region = 12  ;;  %s737_s23 = sshll.u32 (!%p539_p7), %s677_s15, 3 }
  0x12   : > { %s57_s24 = sld [smem:[#allocation4 + %s737_s23]] (!%p539_p7)  ;;  %s540_s25 = sshll.u32 (!%p539_p7), %s53_s22, 3 }
  0x13   : > { %s745_s29 = scalar_lea.vmem (!%p539_p7), [#allocation5], %s540_s25 }
  0x18   : > { %s58_s28 = scalar_lea.vmem %s815_s1, %s57_s24 }
  0x19   : > { %v73_v0 = vld [vmem:[%s58_s28] sm:$0x1] }
  0x1a   : > { %74 = vst [vmem:[%s745_s29] sm:$0x1] %v73_v0 }
  0x1b   : > { %92 = vsyncadd [#allocation2], 16  ;;  %s93_s30 = sadd.s32 1, %s737_s23 }
  0x1c   : > { %s94_s3 = sld [smem:[#allocation4 + %s93_s30]] }
  0x22   : > { %s95_s6 = scalar_lea.vmem %s815_s1, %s94_s3 }
  0x23   : > { %v112_v1 = vld [vmem:[%s95_s6] sm:$0x1] }
  0x24   : > { %542 = vst [vmem:[%s745_s29 + $0x1] sm:$0x1] %v112_v1 }
  0x25   : > { %131 = vsyncadd [#allocation2 + $0x1], 16  ;;  %s132_s7 = sadd.s32 2, %s737_s23 }
  0x26   : > { %s133_s8 = sld [smem:[#allocation4 + %s132_s7]] }
  0x2c   : > { %s134_s11 = scalar_lea.vmem %s815_s1, %s133_s8 }
  0x2d   : > { %v151_v2 = vld [vmem:[%s134_s11] sm:$0x1] }
  0x2e   : > { %543 = vst [vmem:[%s745_s29 + $0x2] sm:$0x1] %v151_v2 }
  0x2f   : > { %170 = vsyncadd [#allocation2 + $0x2], 16  ;;  %s171_s12 = sadd.s32 3, %s737_s23 }
  0x30   : > { %s172_s0 = sld [smem:[#allocation4 + %s171_s12]] }
  0x36   : > { %s173_s24 = scalar_lea.vmem %s815_s1, %s172_s0 }
  0x37   : > { %v190_v3 = vld [vmem:[%s173_s24] sm:$0x1] }
  0x38   : > { %544 = vst [vmem:[%s745_s29 + $0x3] sm:$0x1] %v190_v3 }
  0x39   : > { %209 = vsyncadd [#allocation2 + $0x3], 16  ;;  %s210_s25 = sadd.s32 4, %s737_s23 }
  0x3a   : > { %s211_s26 = sld [smem:[#allocation4 + %s210_s25]] }
  0x40   : > { %s212_s30 = scalar_lea.vmem %s815_s1, %s211_s26 }
  0x41   : > { %v229_v4 = vld [vmem:[%s212_s30] sm:$0x1] }
  0x42   : > { %545 = vst [vmem:[%s745_s29 + $0x4] sm:$0x1] %v229_v4 }
  0x43   : > { %248 = vsyncadd [#allocation2 + $0x4], 16  ;;  %s249_s3 = sadd.s32 5, %s737_s23 }
  0x44   : > { %s250_s4 = sld [smem:[#allocation4 + %s249_s3]] }
  0x4a   : > { %s251_s7 = scalar_lea.vmem %s815_s1, %s250_s4 }
  0x4b   : > { %v268_v5 = vld [vmem:[%s251_s7] sm:$0x1] }
  0x4c   : > { %546 = vst [vmem:[%s745_s29 + $0x5] sm:$0x1] %v268_v5 }
  0x4d   : > { %287 = vsyncadd [#allocation2 + $0x5], 16  ;;  %s288_s8 = sadd.s32 6, %s737_s23 }
  0x4e   : > { %s289_s9 = sld [smem:[#allocation4 + %s288_s8]] }
  0x54   : > { %s290_s12 = scalar_lea.vmem %s815_s1, %s289_s9 }
  0x55   : > { %v307_v6 = vld [vmem:[%s290_s12] sm:$0x1] }
  0x56   : > { %547 = vst [vmem:[%s745_s29 + $0x6] sm:$0x1] %v307_v6 }
  0x57   : > { %326 = vsyncadd [#allocation2 + $0x6], 16  ;;  %s327_s0 = sadd.s32 7, %s737_s23 }
  0x58   : > { %s328_s17 = sld [smem:[#allocation4 + %s327_s0]] }
  0x5e   : > { %s329_s25 = scalar_lea.vmem %s815_s1, %s328_s17 }
  0x5f   : > { %v346_v7 = vld [vmem:[%s329_s25] sm:$0x1] }
  0x60   : > { %548 = vst [vmem:[%s745_s29 + $0x7] sm:$0x1] %v346_v7 }
  0x61   : > { %365 = vsyncadd [#allocation2 + $0x7], 16 }
  0x62   : > { %647 = dma.done.wait [#allocation2], 16 }
  0x63   : > { %648 = vsyncadd [#allocation2], 4294967280 }
  0x64   : > { %649 = dma.done.wait [#allocation2 + $0x1], 16 }
  0x65   : > { %650 = vsyncadd [#allocation2 + $0x1], 4294967280 }
  0x66   : > { %651 = dma.done.wait [#allocation2 + $0x2], 16 }
  0x67   : > { %652 = vsyncadd [#allocation2 + $0x2], 4294967280 }
  0x68   : > { %653 = dma.done.wait [#allocation2 + $0x3], 16 }
  0x69   : > { %654 = vsyncadd [#allocation2 + $0x3], 4294967280 }
  0x6a   : > { %655 = dma.done.wait [#allocation2 + $0x4], 16 }
  0x6b   : > { %656 = vsyncadd [#allocation2 + $0x4], 4294967280 }
  0x6c   : > { %657 = dma.done.wait [#allocation2 + $0x5], 16 }
  0x6d   : > { %658 = vsyncadd [#allocation2 + $0x5], 4294967280 }
  0x6e   : > { %659 = dma.done.wait [#allocation2 + $0x6], 16 }
  0x6f   : > { %660 = vsyncadd [#allocation2 + $0x6], 4294967280 }
  0x70   : > { %661 = dma.done.wait [#allocation2 + $0x7], 16 }
  0x71   : > { %662 = vsyncadd [#allocation2 + $0x7], 4294967280  ;;  %s394_s28 = scalar_lea.hbm %s816_s2, %s737_s23  ;;  %s396_s30 = sshll.u32 %s745_s29, 4  ;;  %s397_s30 = int_to_ptr.vmem [resolvable:$true] %s396_s30 }
  0x72   : > { %s398_s3 = sshll.u32 %s394_s28, 4  ;;  %s384_s4 = scalar_lea.sflag [#allocation6], %s53_s22  ;;  %s399_s3 = int_to_ptr.hbm [resolvable:$true] %s398_s3 }
  0x73   : > { %s619_s5 = sshra.s32 %s399_s3, 4  ;;  %s625_s9 = scalar_lea.hbm %s816_s2, 16  ;;  %s620_s5 = int_to_ptr.hbm [resolvable:$true] %s619_s5 }
  0x74   : > { %s621_s6 = scalar_lea.hbm %s620_s5, 8  ;;  %p626_p11 = scmp.lt.s32.totalorder %s620_s5, %s816_s2 }
  0x75   : > { %p622_p8 = scmp.ne.s32.totalorder %s620_s5, %s621_s6  ;;  %p627_p12 = scmp.lt.s32.totalorder %s625_s9, %s621_s6 }
  0x77   : > { %p623_p9 = pnand %p622_p8, %p726_p4  ;;  %p628_p13 = por %p627_p12, %p626_p11 }
  0x79   : > { %p624_p10 = pneg %p623_p9 }
  0x7b   : > { %p629_p0 = pnand %p628_p13, %p624_p10 }
  0x7d   : > { %632 = shalt.err (!%p629_p0)
}
  0x7e   : > { %561 = dma.vmem_to_hbm [thread:$0]  (%p726_p4), %s397_s30, 128, %s399_s3, %s384_s4  }
  0x7f PF: > { %p567_p1 = scmp.ge.s32.totalorder %s677_s15, 1  ;;  %s410_s22 = sand.u32 1, %s669_s13  }
  0x80   : > { %s411_s23 = scalar_lea.sflag [#allocation6], %s410_s22 }
  0x81   : > { %p564_p2 = pnand %p567_p1, %p730_p6 }
  0x83   : > { %p565_p3 = pneg %p564_p2 }
  0x85   : > { %664 = dma.done.wait (%p565_p3), %s411_s23, 128  }
  0x86   : > { %666 = vsyncadd (%p565_p3), %s411_s23, 4294967168  ;;  %p20_p5 = scmp.ge.s32.totalorder %s715_s16, 3   ;;  %s819_s13 = smov %s673_s14 }
  0x87   : > { %s820_s14 = smov %s724_s19  ;;  %s821_s15 = smov %s715_s16 }
  0x88   :  { %22 = sbr.rel (!%p20_p5) target bundleno = 9 (0x9), region = 345 }
  0x8d   :  { %417 = vsyncpa [#allocation6], 1 }
  0x8e   :  { %419 = vsyncpa [#allocation6 + $0x1], 1 }
  0x8f   :  { %420 = vsyncmov [#allocation2] }
  0x92   :  { %s421_s15 = vpop.sfrf %420 }
  0x93   :  { %p553_p4 = scmp.ne.s32.totalorder %s421_s15, 0 }
  0x95   :  { %425 = shalt.err (%p553_p4)  }
  0x96   :  { %427 = vsyncmov [#allocation2 + $0x1] }
  0x99   :  { %s428_s20 = vpop.sfrf %427 }
  0x9a   :  { %p554_p6 = scmp.ne.s32.totalorder %s428_s20, 0 }
  0x9c   :  { %432 = shalt.err (%p554_p6)  }
  0x9d   :  { %434 = vsyncmov [#allocation2 + $0x2] }
  0xa0   :  { %s435_s21 = vpop.sfrf %434 }
  0xa1   :  { %p555_p7 = scmp.ne.s32.totalorder %s435_s21, 0 }
  0xa3   :  { %439 = shalt.err (%p555_p7)  }
  0xa4   :  { %441 = vsyncmov [#allocation2 + $0x3] }
  0xa7   :  { %s442_s29 = vpop.sfrf %441 }
  0xa8   :  { %p556_p8 = scmp.ne.s32.totalorder %s442_s29, 0 }
  0xaa   :  { %446 = shalt.err (%p556_p8)  }
  0xab   :  { %448 = vsyncmov [#allocation2 + $0x4] }
  0xae   :  { %s449_s16 = vpop.sfrf %448 }
  0xaf   :  { %p557_p9 = scmp.ne.s32.totalorder %s449_s16, 0 }
  0xb1   :  { %453 = shalt.err (%p557_p9)  }
  0xb2   :  { %455 = vsyncmov [#allocation2 + $0x5] }
  0xb5   :  { %s456_s1 = vpop.sfrf %455 }
  0xb6   :  { %p558_p10 = scmp.ne.s32.totalorder %s456_s1, 0 }
  0xb8   :  { %460 = shalt.err (%p558_p10)  }
  0xb9   :  { %462 = vsyncmov [#allocation2 + $0x6] }
  0xbc   :  { %s463_s2 = vpop.sfrf %462 }
  0xbd   :  { %p559_p11 = scmp.ne.s32.totalorder %s463_s2, 0 }
  0xbf   :  { %467 = shalt.err (%p559_p11)  }
  0xc0   :  { %469 = vsyncmov [#allocation2 + $0x7] }
  0xc3   :  { %s470_s13 = vpop.sfrf %469 }
  0xc4   :  { %p560_p12 = scmp.ne.s32.totalorder %s470_s13, 0 }
  0xc6   :  { %474 = shalt.err (%p560_p12)  }

</bundles_post_ra>
